<compile_context>
chip_gen: v7x
topology: tpu7x:2x2x1
jax: 0.10.0
libtpu: 0.0.40
codegen_flags: <defaults>
</compile_context>

<pallas_src>
import functools

import jax
import jax.numpy as jnp
from jax.experimental import pallas as pl
from jax.experimental.pallas import tpu as pltpu


def _wce_block_kernel(n_rows, sub_rows, pred_ref, tgt_ref, w_ref, out_ref):
    """One row-block: emit (weighted NLL sum, weight sum) for its rows.

    pred_ref : (TN, C)     logits tile (input dtype; cast to f32 after DMA)
    tgt_ref  : (TN, 1)     i32 class indices tile
    w_ref    : (1, C)      f32 class weights (same block every step)
    out_ref  : (1, 1, 128) f32; lane 0 = sum_i w[t_i]*nll_i, lane 1 = sum_i w[t_i]
    """
    tn, c = pred_ref.shape
    num_sub = tn // sub_rows                      # static
    row0 = pl.program_id(0) * tn
    w = w_ref[...]                                # (1, C) f32

    acc_num = jnp.zeros((1, 1), jnp.float32)
    acc_den = jnp.zeros((1, 1), jnp.float32)

    for s in range(num_sub):                      # static, fully unrolled
        r0 = s * sub_rows
        logits = pred_ref[pl.ds(r0, sub_rows), :].astype(jnp.float32)   # (SB, C)
        tgt = tgt_ref[pl.ds(r0, sub_rows), :]                           # (SB, 1)

        rid = jax.lax.broadcasted_iota(jnp.int32, (sub_rows, 1), 0) + (row0 + r0)
        valid = rid < n_rows                                            # (SB, 1)

        # Ragged last block: rows past N hold uninitialized data (possibly
        # NaN/Inf).  Zero them before max/exp; masking only the onehot is not
        # enough because 0 * NaN = NaN.
        logits = jnp.where(valid, logits, 0.0)

        # Numerically stable per-row log-sum-exp.
        m = jnp.max(logits, axis=-1, keepdims=True)                     # (SB, 1)
        lse = jnp.log(jnp.sum(jnp.exp(logits - m), axis=-1, keepdims=True)) + m

        # One-hot of the target class, zeroed on invalid rows (target garbage
        # in padding rows is therefore harmless).
        col = jax.lax.broadcasted_iota(jnp.int32, (sub_rows, c), 1)     # (SB, C)
        onehot = jnp.where((col == tgt) & valid, 1.0, 0.0).astype(jnp.float32)

        logit_t = jnp.sum(onehot * logits, axis=-1, keepdims=True)      # (SB, 1)
        w_t = jnp.sum(onehot * w, axis=-1, keepdims=True)               # (SB, 1)
        nll = jnp.where(valid, lse - logit_t, 0.0)                      # (SB, 1)

        acc_num = acc_num + jnp.sum(w_t * nll, axis=0, keepdims=True)   # (1, 1)
        acc_den = acc_den + jnp.sum(w_t, axis=0, keepdims=True)         # (1, 1)

    # Lane-dense 128-wide output row (unmasked lane store): lanes 0/1 carry
    # the two partials, the rest are zero.
    lane = jax.lax.broadcasted_iota(jnp.int32, (1, 128), 1)
    row = jnp.where(lane == 0, acc_num, jnp.where(lane == 1, acc_den, 0.0))
    out_ref[...] = row.reshape(1, 1, 128)


@functools.partial(jax.jit, static_argnames=("tile_n",))
def weighted_cross_entropy(pred, target, weight, *, tile_n=512):
    """Equivalent to torch.nn.functional.cross_entropy(pred, target, weight)."""
    n, c = pred.shape
    itemsize = jnp.dtype(pred.dtype).itemsize

    mult = 16 if itemsize < 4 else 8              # bf16 packs 16 rows / sublane group
    sb_cap = 256                                  # rows per in-kernel sub-block
    c_lanes = pl.cdiv(c, 128) * 128               # lane-padded width inside VMEM

    def vmem_est(rows):
        sub = min(rows, sb_cap)
        return (2 * rows * c_lanes * itemsize     # double-buffered logits tiles
                + 2 * rows * 128 * 4              # (rows,1) i32 target pads to 128 lanes
                + 2 * 8 * c_lanes * 4             # weight tile
                + 2 * 8 * 128 * 4                 # output tile
                + 6 * sub * c_lanes * 4)          # in-kernel f32 temporaries

    # VMEM budget with ~25% headroom (v7x: 64 MiB physical; v5e/v6e: 128 MiB).
    try:
        budget = int(pltpu.get_tpu_info().vmem_capacity_bytes) * 3 // 4
    except Exception:  # conservative fallback (v7x-sized)
        budget = 48 * 1024 * 1024

    # Row tile: big enough to amortize per-step overhead, capped at ceil(N/2)
    # so v7x's two TensorCores both get grid blocks, rounded to sublane mult.
    tn = min(tile_n, max(128, pl.cdiv(n, 2)))
    tn = pl.cdiv(tn, mult) * mult
    while vmem_est(tn) > budget and tn > mult:    # derive tn from the budget
        tn = max(mult, ((tn // 2) // mult) * mult)
    sb = min(tn, sb_cap)
    if tn > sb:
        tn = (tn // sb) * sb                      # unrolled sub-blocks tile tn exactly
    num_blocks = pl.cdiv(n, tn)
    vmem_limit = int(min(budget, max(vmem_est(tn) + (2 << 20), 16 << 20)))

    out = pl.pallas_call(
        functools.partial(_wce_block_kernel, n, sb),
        out_shape=jax.ShapeDtypeStruct((num_blocks, 1, 128), jnp.float32),
        grid_spec=pltpu.PrefetchScalarGridSpec(
            num_scalar_prefetch=0,
            grid=(num_blocks,),
            in_specs=[
                # Full-extent class dim (== array dim) -> no padding copy of pred.
                pl.BlockSpec((tn, c), lambda i: (i, 0)),
                pl.BlockSpec((tn, 1), lambda i: (i, 0)),
                pl.BlockSpec((1, c), lambda i: (0, 0)),   # same block every step
            ],
            out_specs=pl.BlockSpec((1, 1, 128), lambda i: (i, 0, 0)),
        ),
        compiler_params=pltpu.CompilerParams(
            dimension_semantics=("parallel",),    # independent blocks (megacore on v7x)
            vmem_limit_bytes=vmem_limit,
        ),
    )(
        pred,                                             # unpadded, original dtype
        target.astype(jnp.int32).reshape(n, 1),
        weight.astype(jnp.float32).reshape(1, c),
    )

    # Tiny epilogue: combine per-block partials and form the weighted mean.
    sums = jnp.sum(out, axis=(0, 1))              # (128,)
    return (sums[0] / sums[1]).astype(jnp.float32)


def _reference(pred, target, weight):
    """Pure-JAX reference of weighted cross entropy (reduction='mean')."""
    logp = jax.nn.log_softmax(pred.astype(jnp.float32), axis=-1)
    nll = -jnp.take_along_axis(logp, target[:, None].astype(jnp.int32), axis=-1)[:, 0]
    w_t = weight[target]
    return jnp.sum(w_t * nll) / jnp.sum(w_t)


if __name__ == "__main__":
    key = jax.random.PRNGKey(0)
    k1, k2, k3 = jax.random.split(key, 3)

    N, C = 128, 32
    pred = jax.random.normal(k1, (N, C), dtype=jnp.float32)
    target = jax.random.randint(k2, (N,), 0, C, dtype=jnp.int32)
    weight = jax.random.uniform(k3, (C,), dtype=jnp.float32, minval=0.5, maxval=2.0)

    loss = jax.block_until_ready(weighted_cross_entropy(pred, target, weight))
    ref = _reference(pred, target, weight)
    assert jnp.allclose(loss, ref, rtol=1e-5, atol=1e-5), (loss, ref)

    # Ragged-N path (partial row block handled by the in-kernel mask, no pad).
    N2 = 100
    loss2 = jax.block_until_ready(
        weighted_cross_entropy(pred[:N2], target[:N2], weight))
    ref2 = _reference(pred[:N2], target[:N2], weight)
    assert jnp.allclose(loss2, ref2, rtol=1e-5, atol=1e-5), (loss2, ref2)

    # bf16 logits path (half the HBM bytes; cast to f32 inside the kernel).
    pred_bf = pred.astype(jnp.bfloat16)
    loss3 = jax.block_until_ready(weighted_cross_entropy(pred_bf, target, weight))
    ref3 = _reference(pred_bf.astype(jnp.float32), target, weight)
    assert jnp.allclose(loss3, ref3, rtol=1e-3, atol=1e-3), (loss3, ref3)

    print("KERNEL_OK")
</pallas_src>

<mosaic_0001>
module attributes {stable_mosaic.version = 11 : i64} {
  func.func @_wce_block_kernel(%arg0: i32, %arg1: memref<128x32xf32, #tpu.memory_space<vmem>>, %arg2: memref<128x1xi32, #tpu.memory_space<vmem>>, %arg3: memref<1x32xf32, #tpu.memory_space<vmem>>, %arg4: memref<1x1x128xf32, #tpu.memory_space<vmem>>) attributes {dimension_semantics = [#tpu.dimension_semantics<parallel>], iteration_bounds = array<i64: 1>, scalar_prefetch = 0 : i64, scratch_operands = 0 : i64, tpu.core_type = #tpu.core_type<tc>, window_params = [{transform_indices = @transform_0, window_bounds = array<i64: 128, 32>}, {transform_indices = @transform_1, window_bounds = array<i64: 128, 1>}, {pipeline_mode = #tpu.pipeline_mode<synchronous>, transform_indices = @transform_2, window_bounds = array<i64: 1, 32>}, {transform_indices = @transform_3, window_bounds = array<i64: 1, 1, 128>}]} {
    %c128_i32 = arith.constant 128 : i32
    %0 = arith.muli %arg0, %c128_i32 : i32
    %c0 = arith.constant 0 : index
    %c0_0 = arith.constant 0 : index
    %1 = vector.load %arg3[%c0, %c0_0] : memref<1x32xf32, #tpu.memory_space<vmem>>, vector<1x32xf32>
    %cst = arith.constant 0.000000e+00 : f32
    %2 = vector.broadcast %cst : f32 to vector<1x1xf32>
    %cst_1 = arith.constant 0.000000e+00 : f32
    %3 = vector.broadcast %cst_1 : f32 to vector<1x1xf32>
    %c0_2 = arith.constant 0 : index
    %c0_3 = arith.constant 0 : index
    %4 = vector.load %arg1[%c0_2, %c0_3] : memref<128x32xf32, #tpu.memory_space<vmem>>, vector<128x32xf32>
    %c0_4 = arith.constant 0 : index
    %c0_5 = arith.constant 0 : index
    %5 = vector.load %arg2[%c0_4, %c0_5] : memref<128x1xi32, #tpu.memory_space<vmem>>, vector<128x1xi32>
    %6 = tpu.iota {dimensions = array<i32: 0>} : vector<128x1xi32>
    %c0_i32 = arith.constant 0 : i32
    %7 = arith.addi %0, %c0_i32 : i32
    %8 = vector.broadcast %7 : i32 to vector<128x1xi32>
    %9 = arith.addi %6, %8 : vector<128x1xi32>
    %c128_i32_6 = arith.constant 128 : i32
    %10 = vector.broadcast %c128_i32_6 : i32 to vector<128x1xi32>
    %11 = arith.cmpi slt, %9, %10 : vector<128x1xi32>
    %cst_7 = arith.constant 0.000000e+00 : f32
    %12 = vector.shape_cast %11 : vector<128x1xi1> to vector<128x1xi1>
    %13 = vector.broadcast %12 : vector<128x1xi1> to vector<128x32xi1>
    %14 = vector.broadcast %cst_7 : f32 to vector<128x32xf32>
    %15 = arith.select %13, %4, %14 : vector<128x32xi1>, vector<128x32xf32>
    %cst_8 = arith.constant dense<0xFF800000> : vector<128xf32>
    %16 = vector.multi_reduction <maximumf>, %15, %cst_8 [1] : vector<128x32xf32> to vector<128xf32>
    %17 = vector.shape_cast %16 : vector<128xf32> to vector<128x1xf32>
    %18 = vector.broadcast %17 : vector<128x1xf32> to vector<128x32xf32>
    %19 = arith.subf %15, %18 : vector<128x32xf32>
    %20 = math.exp %19 : vector<128x32xf32>
    %cst_9 = arith.constant dense<0.000000e+00> : vector<128xf32>
    %21 = vector.multi_reduction <add>, %20, %cst_9 [1] : vector<128x32xf32> to vector<128xf32>
    %22 = vector.shape_cast %21 : vector<128xf32> to vector<128x1xf32>
    %23 = math.log %22 : vector<128x1xf32>
    %24 = arith.addf %23, %17 : vector<128x1xf32>
    %25 = tpu.iota {dimensions = array<i32: 1>} : vector<128x32xi32>
    %26 = vector.broadcast %5 : vector<128x1xi32> to vector<128x32xi32>
    %27 = arith.cmpi eq, %25, %26 : vector<128x32xi32>
    %28 = vector.broadcast %11 : vector<128x1xi1> to vector<128x32xi1>
    %29 = arith.andi %27, %28 : vector<128x32xi1>
    %cst_10 = arith.constant 1.000000e+00 : f32
    %cst_11 = arith.constant 0.000000e+00 : f32
    %30 = vector.broadcast %cst_10 : f32 to vector<128x32xf32>
    %31 = vector.broadcast %cst_11 : f32 to vector<128x32xf32>
    %32 = arith.select %29, %30, %31 : vector<128x32xi1>, vector<128x32xf32>
    %33 = arith.mulf %32, %15 : vector<128x32xf32>
    %cst_12 = arith.constant dense<0.000000e+00> : vector<128xf32>
    %34 = vector.multi_reduction <add>, %33, %cst_12 [1] : vector<128x32xf32> to vector<128xf32>
    %35 = vector.shape_cast %34 : vector<128xf32> to vector<128x1xf32>
    %36 = vector.broadcast %1 : vector<1x32xf32> to vector<128x32xf32>
    %37 = arith.mulf %32, %36 : vector<128x32xf32>
    %cst_13 = arith.constant dense<0.000000e+00> : vector<128xf32>
    %38 = vector.multi_reduction <add>, %37, %cst_13 [1] : vector<128x32xf32> to vector<128xf32>
    %39 = vector.shape_cast %38 : vector<128xf32> to vector<128x1xf32>
    %40 = arith.subf %24, %35 : vector<128x1xf32>
    %cst_14 = arith.constant 0.000000e+00 : f32
    %41 = vector.broadcast %cst_14 : f32 to vector<128x1xf32>
    %42 = arith.select %11, %40, %41 : vector<128x1xi1>, vector<128x1xf32>
    %43 = arith.mulf %39, %42 : vector<128x1xf32>
    %cst_15 = arith.constant dense<0.000000e+00> : vector<1xf32>
    %44 = vector.multi_reduction <add>, %43, %cst_15 [0] : vector<128x1xf32> to vector<1xf32>
    %45 = vector.shape_cast %44 : vector<1xf32> to vector<1x1xf32>
    %46 = arith.addf %2, %45 : vector<1x1xf32>
    %cst_16 = arith.constant dense<0.000000e+00> : vector<1xf32>
    %47 = vector.multi_reduction <add>, %39, %cst_16 [0] : vector<128x1xf32> to vector<1xf32>
    %48 = vector.shape_cast %47 : vector<1xf32> to vector<1x1xf32>
    %49 = arith.addf %3, %48 : vector<1x1xf32>
    %50 = tpu.iota {dimensions = array<i32: 1>} : vector<1x128xi32>
    %c0_i32_17 = arith.constant 0 : i32
    %51 = vector.broadcast %c0_i32_17 : i32 to vector<1x128xi32>
    %52 = arith.cmpi eq, %50, %51 : vector<1x128xi32>
    %c1_i32 = arith.constant 1 : i32
    %53 = vector.broadcast %c1_i32 : i32 to vector<1x128xi32>
    %54 = arith.cmpi eq, %50, %53 : vector<1x128xi32>
    %cst_18 = arith.constant 0.000000e+00 : f32
    %55 = vector.shape_cast %49 : vector<1x1xf32> to vector<1x1xf32>
    %56 = vector.broadcast %55 : vector<1x1xf32> to vector<1x128xf32>
    %57 = vector.broadcast %cst_18 : f32 to vector<1x128xf32>
    %58 = arith.select %54, %56, %57 : vector<1x128xi1>, vector<1x128xf32>
    %59 = vector.shape_cast %46 : vector<1x1xf32> to vector<1x1xf32>
    %60 = vector.broadcast %59 : vector<1x1xf32> to vector<1x128xf32>
    %61 = arith.select %52, %60, %58 : vector<1x128xi1>, vector<1x128xf32>
    %62 = vector.shape_cast %61 : vector<1x128xf32> to vector<1x1x128xf32>
    %c0_19 = arith.constant 0 : index
    %c0_20 = arith.constant 0 : index
    %c0_21 = arith.constant 0 : index
    %63 = vector.load %arg4[%c0_19, %c0_20, %c0_21] : memref<1x1x128xf32, #tpu.memory_space<vmem>>, vector<1x1x128xf32>
    tpu.vector_store %arg4[%c0_19, %c0_20, %c0_21], %62 {strides = array<i32>} : memref<1x1x128xf32, #tpu.memory_space<vmem>>, vector<1x1x128xf32>,
    return
  }
  func.func @transform_0(%arg0: i32) -> (i32, i32) {
    %c0_i32 = arith.constant 0 : i32
    %c0_i32_0 = arith.constant 0 : i32
    return %arg0, %c0_i32 : i32, i32
  }
  func.func @transform_1(%arg0: i32) -> (i32, i32) {
    %c0_i32 = arith.constant 0 : i32
    %c0_i32_0 = arith.constant 0 : i32
    return %arg0, %c0_i32 : i32, i32
  }
  func.func @transform_2(%arg0: i32) -> (i32, i32) {
    %c0_i32 = arith.constant 0 : i32
    %c0_i32_0 = arith.constant 0 : i32
    %c0_i32_1 = arith.constant 0 : i32
    return %c0_i32, %c0_i32_0 : i32, i32
  }
  func.func @transform_3(%arg0: i32) -> (i32, i32, i32) {
    %c0_i32 = arith.constant 0 : i32
    %c0_i32_0 = arith.constant 0 : i32
    %c0_i32_1 = arith.constant 0 : i32
    return %arg0, %c0_i32, %c0_i32_0 : i32, i32, i32
  }
}

</mosaic_0001>

<bundles_post_ra>
// kernel: weighted_cross_entropy.1
= control target key start
LH: loop header
LB: loop body
LE: loop exit
PB: predicated region body
PF: predicated region fallthrough
CT: control target
= control target key end

     0   :  { %vm146_vm0 = vcmask 261120   ;;  %v741_v3 = vmov 0   ;;  %v339_v62 = vlaneseq  ;;  %s1241_s0 = inlined_call_operand.vmem [shape: f32[128,32], index: 0, kind: input, shape index: {}]   ;;  %s1242_s1 = inlined_call_operand.vmem [shape: s32[128,1], index: 1, kind: input, shape index: {}]   ;;  %s1243_s2 = inlined_call_operand.vmem [shape: f32[1,32], index: 2, kind: input, shape index: {}]   ;;  %s1244_s3 = inlined_call_operand.vmem [shape: f32[1,1,128], index: 3, kind: output, shape index: {}]  }
   0x1   :  { %v766_v0 = vld [vmem:[%s1241_s0 + $0x10] sm:$0xff]  ;;  %v771_v1 = vld [vmem:[%s1241_s0] sm:$0xff]  ;;  %v776_v2 = vld [vmem:[%s1241_s0 + $0x18] sm:$0xff]  ;;  %676 = vset.pattern.permute.xlu1 %v741_v3  ;;  %675 = vset.pattern.permute.xlu0 %v741_v3 }
   0x2   :  { %v153_v4 = vsel %vm146_vm0, %v766_v0, -inf  ;;  %v147_v5 = vsel %vm146_vm0, %v771_v1, -inf  ;;  %v785_v6 = vld [vmem:[%s1241_s0 + $0x8] sm:$0xff]  ;;  %v156_v7 = vsel %vm146_vm0, %v776_v2, -inf  ;;  %v799_v10 = vld [vmem:[%s1241_s0 + $0x20] sm:$0xff]  ;;  %v808_v13 = vld [vmem:[%s1241_s0 + $0x38] sm:$0xff] }
   0x3   :  { %154 = vmax.xlane.f32.xlu1 %v153_v4  ;;  %148 = vmax.xlane.f32.xlu0 %v147_v5  ;;  %v150_v8 = vsel %vm146_vm0, %v785_v6, -inf  ;;  %v794_v9 = vld [vmem:[%s1241_s0 + $0x28] sm:$0xff]  ;;  %v159_v12 = vsel %vm146_vm0, %v799_v10, -inf  ;;  %v813_v14 = vld [vmem:[%s1241_s0 + $0x30] sm:$0xff]  ;;  %v168_v15 = vsel %vm146_vm0, %v808_v13, -inf  ;;  %v827_v18 = vld [vmem:[%s1241_s0 + $0x40] sm:$0xff] }
   0x4   :  { %v162_v11 = vsel %vm146_vm0, %v794_v9, -inf  ;;  %v165_v16 = vsel %vm146_vm0, %v813_v14, -inf  ;;  %v822_v17 = vld [vmem:[%s1241_s0 + $0x48] sm:$0xff]  ;;  %v171_v20 = vsel %vm146_vm0, %v827_v18, -inf  ;;  %v836_v21 = vld [vmem:[%s1241_s0 + $0x58] sm:$0xff]  ;;  %v841_v22 = vld [vmem:[%s1241_s0 + $0x50] sm:$0xff] }
   0x5   :  { %v174_v19 = vsel %vm146_vm0, %v822_v17, -inf  ;;  %v180_v23 = vsel %vm146_vm0, %v836_v21, -inf  ;;  %v177_v24 = vsel %vm146_vm0, %v841_v22, -inf  ;;  %v850_v25 = vld [vmem:[%s1241_s0 + $0x68] sm:$0xff]  ;;  %v855_v26 = vld [vmem:[%s1241_s0 + $0x60] sm:$0xff]  ;;  %v864_v29 = vld [vmem:[%s1241_s0 + $0x78] sm:$0xff] }
   0x6   :  { %v186_v27 = vsel %vm146_vm0, %v850_v25, -inf  ;;  %v183_v28 = vsel %vm146_vm0, %v855_v26, -inf  ;;  %v869_v30 = vld [vmem:[%s1241_s0 + $0x70] sm:$0xff]  ;;  %v192_v31 = vsel %vm146_vm0, %v864_v29, -inf  ;;  %v33_v33 = vld [vmem:[%s1242_s1 + $0x8] sm:$0xff]  ;;  %v32_v35 = vld [vmem:[%s1242_s1] sm:$0xff] }
   0x7   :  { %157 = vmax.xlane.f32.xlu1 %v156_v7  ;;  %151 = vmax.xlane.f32.xlu0 %v150_v8  ;;  %v189_v32 = vsel %vm146_vm0, %v869_v30, -inf  ;;  %v34_v34 = vld [vmem:[%s1242_s1 + $0x10] sm:$0xff]  ;;  %v35_v36 = vld [vmem:[%s1242_s1 + $0x18] sm:$0xff]  ;;  %v41_v37 = vld [vmem:[%s1242_s1 + $0x48] sm:$0xff]  ;;  %v953_v4 = vand.u32 127, %v339_v62  ;;  %v742_v8 = vmov 0.0  }
   0x8   :  { %v36_v38 = vld [vmem:[%s1242_s1 + $0x20] sm:$0xff]  ;;  %v43_v39 = vld [vmem:[%s1242_s1 + $0x58] sm:$0xff]  ;;  %v37_v40 = vld [vmem:[%s1242_s1 + $0x28] sm:$0xff] }
   0x9   :  { %v45_v41 = vld [vmem:[%s1242_s1 + $0x68] sm:$0xff]  ;;  %v38_v42 = vld [vmem:[%s1242_s1 + $0x30] sm:$0xff]  ;;  %v47_v43 = vld [vmem:[%s1242_s1 + $0x78] sm:$0xff] }
   0xa   :  { %v39_v44 = vld [vmem:[%s1242_s1 + $0x38] sm:$0xff]  ;;  %v40_v45 = vld [vmem:[%s1242_s1 + $0x40] sm:$0xff]  ;;  %v42_v46 = vld [vmem:[%s1242_s1 + $0x50] sm:$0xff] }
   0xb   :  { %163 = vmax.xlane.f32.xlu1 %v162_v11  ;;  %160 = vmax.xlane.f32.xlu0 %v159_v12  ;;  %v44_v47 = vld [vmem:[%s1242_s1 + $0x60] sm:$0xff]  ;;  %v46_v48 = vld [vmem:[%s1242_s1 + $0x70] sm:$0xff] }
   0xf   :  { %169 = vmax.xlane.f32.xlu1 %v168_v15  ;;  %166 = vmax.xlane.f32.xlu0 %v165_v16 }
  0x13   :  { %175 = vmax.xlane.f32.xlu1 %v174_v19  ;;  %172 = vmax.xlane.f32.xlu0 %v171_v20 }
  0x17   :  { %181 = vmax.xlane.f32.xlu1 %v180_v23  ;;  %178 = vmax.xlane.f32.xlu0 %v177_v24  ;;  %v970_v24 = vld [vmem:[%s1243_s2] ss:$0 sm:$0xff] }
  0x1b   :  { %187 = vmax.xlane.f32.xlu1 %v186_v27  ;;  %184 = vmax.xlane.f32.xlu0 %v183_v28 }
  0x1f   :  { %193 = vmax.xlane.f32.xlu1 %v192_v31  ;;  %190 = vmax.xlane.f32.xlu0 %v189_v32 }
  0x30   :  { %345 = vperm.xlu1 %676, %v33_v33  }
  0x34   :  { %348 = vperm.xlu1 %676, %v34_v34  }
  0x35   :  { %342 = vperm.xlu0 %675, %v32_v35  }
  0x38   :  { %351 = vperm.xlu1 %676, %v35_v36  }
  0x39   :  { %369 = vperm.xlu0 %675, %v41_v37  }
  0x3c   :  { %354 = vperm.xlu1 %676, %v36_v38  }
  0x3d   :  { %375 = vperm.xlu0 %675, %v43_v39  }
  0x40   :  { %357 = vperm.xlu1 %676, %v37_v40  }
  0x41   :  { %381 = vperm.xlu0 %675, %v45_v41  }
  0x44   :  { %360 = vperm.xlu1 %676, %v38_v42  }
  0x45   :  { %387 = vperm.xlu0 %675, %v47_v43  }
  0x48   :  { %363 = vperm.xlu1 %676, %v39_v44  }
  0x4c   :  { %366 = vperm.xlu1 %676, %v40_v45  }
  0x50   :  { %372 = vperm.xlu1 %676, %v42_v46  }
  0x54   :  { %378 = vperm.xlu1 %676, %v44_v47  }
  0x58   :  { %384 = vperm.xlu1 %676, %v46_v48  }
  0x90   :  { %v923_v49 = vpop.xlane.xlu1 %154  ;;  %v925_v50 = vpop.xlane.xlu0 %148 }
  0x91   :  { %v195_v12 = vsub.f32 %v771_v1, %v925_v50  ;;  %v197_v27 = vsub.f32 %v766_v0, %v923_v49 }
  0x93   :  { %v211_v31 = vmul.f32 1.442695, %v195_v12  ;;  %v215_v42 = vmul.f32 1.442695, %v197_v27 }
  0x94   :  { %v927_v51 = vpop.xlane.xlu1 %157  ;;  %v929_v52 = vpop.xlane.xlu0 %151 }
  0x95   :  { %v196_v16 = vsub.f32 %v785_v6, %v929_v52  ;;  %v198_v32 = vsub.f32 %v776_v2, %v927_v51  ;;  %677 = vpow2.f32 %v211_v31 }
  0x97   :  { %v213_v35 = vmul.f32 1.442695, %v196_v16  ;;  %v217_v43 = vmul.f32 1.442695, %v198_v32 }
  0x98   :  { %v931_v53 = vpop.xlane.xlu1 %163  ;;  %v933_v54 = vpop.xlane.xlu0 %160 }
  0x99   :  { %v200_v44 = vsub.f32 %v794_v9, %v931_v53  ;;  %v199_v45 = vsub.f32 %v799_v10, %v933_v54  ;;  %679 = vpow2.f32 %v213_v35 }
  0x9a   :  { %681 = vpow2.f32 %v215_v42 }
  0x9b   :  { %683 = vpow2.f32 %v217_v43 }
  0x9c   :  { %v935_v55 = vpop.xlane.xlu1 %169  ;;  %v937_v56 = vpop.xlane.xlu0 %166 }
  0x9d   :  { %v201_v27 = vsub.f32 %v813_v14, %v937_v56 }
  0x9f   :  { %v678_v42 = vpop.eup %677 }
  0xa0   :  { %v939_v57 = vpop.xlane.xlu1 %175  ;;  %v941_v58 = vpop.xlane.xlu0 %172 }
  0xa4   :  { %v943_v59 = vpop.xlane.xlu1 %181  ;;  %v945_v60 = vpop.xlane.xlu0 %178 }
  0xa8   :  { %v947_v61 = vpop.xlane.xlu1 %187  ;;  %v949_v63 = vpop.xlane.xlu0 %184 }
  0xac   :  { %v951_v3 = vpop.xlane.xlu1 %193  ;;  %v955_v5 = vpop.xlane.xlu0 %190 }
  0xb0   :  { %v346_v7 = vpop.permute.xlu1 %345 }
  0xb1   :  { %vm390_vm1 = vcmp.eq.s32.totalorder %v953_v4, %v346_v7 }
  0xb2   :  { %v422_v11 = vsel %vm390_vm1, 1.0, %v742_v8 }
  0xb3   :  { %v438_v15 = vmul.f32 %v422_v11, %v785_v6  ;;  %v508_v38 = vmul.f32 %v970_v24, %v422_v11 }
  0xb4   :  { %v349_v19 = vpop.permute.xlu1 %348  ;;  %v343_v20 = vpop.permute.xlu0 %342 }
  0xb5   :  { %vm391_vm2 = vcmp.eq.s32.totalorder %v953_v4, %v349_v19  ;;  %vm389_vm3 = vcmp.eq.s32.totalorder %v953_v4, %v343_v20  ;;  %v456_v23 = vsel %vm146_vm0, %v438_v15, 0.0  ;;  %v526_v48 = vsel %vm146_vm0, %v508_v38, 0.0 }
  0xb6   :  { %v423_v28 = vsel %vm391_vm2, 1.0, %v742_v8  ;;  %v421_v6 = vsel %vm389_vm3, 1.0, %v742_v8  ;;  %457 = vadd.xlane.f32.xlu0 %v456_v23  ;;  %v221_v19 = vmul.f32 1.442695, %v200_v44  ;;  %v202_v20 = vsub.f32 %v808_v13, %v935_v55  ;;  %v680_v44 = vpop.eup %679 }
  0xb7   :  { %v439_v33 = vmul.f32 %v423_v28, %v766_v0  ;;  %v437_v34 = vmul.f32 %v421_v6, %v771_v1  ;;  %v507_v39 = vmul.f32 %v970_v24, %v421_v6  ;;  %v509_v62 = vmul.f32 %v970_v24, %v423_v28 }
  0xb8   :  { %v352_v36 = vpop.permute.xlu1 %351  ;;  %v370_v37 = vpop.permute.xlu0 %369  ;;  %v219_v23 = vmul.f32 1.442695, %v199_v45  ;;  %685 = vpow2.f32 %v221_v19  ;;  %vm663_vm2 = vcmp.eq.s32.totalorder %v953_v4, 0 }
  0xb9   :  { %vm392_vm4 = vcmp.eq.s32.totalorder %v953_v4, %v352_v36  ;;  %vm398_vm5 = vcmp.eq.s32.totalorder %v953_v4, %v370_v37  ;;  %v459_v40 = vsel %vm146_vm0, %v439_v33, 0.0  ;;  %v453_v41 = vsel %vm146_vm0, %v437_v34, 0.0 }
  0xba   :  { %v424_v0 = vsel %vm392_vm4, 1.0, %v742_v8  ;;  %v988_v1 = vsel %vm398_vm5, 1.0, %v742_v8  ;;  %460 = vadd.xlane.f32.xlu0 %v459_v40  ;;  %454 = vadd.xlane.f32.xlu1 %v453_v41  ;;  %v523_v11 = vsel %vm146_vm0, %v507_v39, 0.0  ;;  %v529_v6 = vsel %vm146_vm0, %v509_v62, 0.0  ;;  %v682_v62 = vpop.eup %681 }
  0xbb   :  { %v998_v7 = vmul.f32 %v970_v24, %v988_v1  ;;  %v440_v12 = vmul.f32 %v424_v0, %v776_v2  ;;  %v510_v33 = vmul.f32 %v970_v24, %v424_v0  ;;  %v225_v36 = vmul.f32 1.442695, %v202_v20  ;;  %v684_v20 = vpop.eup %683 }
  0xbc   :  { %v355_v46 = vpop.permute.xlu1 %354  ;;  %v376_v47 = vpop.permute.xlu0 %375  ;;  %v204_v37 = vsub.f32 %v822_v17, %v939_v57  ;;  %687 = vpow2.f32 %v219_v23  ;;  %v223_v39 = vmul.f32 1.442695, %v201_v27  ;;  %v203_v40 = vsub.f32 %v827_v18, %v941_v58 }
  0xbd   :  { %vm393_vm6 = vcmp.eq.s32.totalorder %v953_v4, %v355_v46  ;;  %vm400_vm7 = vcmp.eq.s32.totalorder %v953_v4, %v376_v47  ;;  %v462_v32 = vsel %vm146_vm0, %v440_v12, 0.0  ;;  %v532_v0 = vsel %vm146_vm0, %v510_v33, 0.0 }
  0xbe   :  { %v1005_v15 = vsel %vm393_vm6, 1.0, %v742_v8  ;;  %v1008_v16 = vsel %vm400_vm7, 1.0, %v742_v8  ;;  %527 = vadd.xlane.f32.xlu0 %v526_v48  ;;  %524 = vadd.xlane.f32.xlu1 %v523_v11  ;;  %689 = vpow2.f32 %v225_v36  ;;  %v229_v46 = vmul.f32 1.442695, %v204_v37 }
  0xbf   :  { %v1019_v31 = vmul.f32 %v970_v24, %v1008_v16  ;;  %v441_v34 = vmul.f32 %v1005_v15, %v799_v10  ;;  %v206_v47 = vsub.f32 %v836_v21, %v943_v59  ;;  %691 = vpow2.f32 %v223_v39 }
  0xc0   :  { %v1014_v28 = vpop.permute.xlu1 %357  ;;  %v382_v2 = vpop.permute.xlu0 %381  ;;  %v227_v11 = vmul.f32 1.442695, %v203_v40  ;;  %v205_v12 = vsub.f32 %v841_v22, %v945_v60  ;;  %v243_v23 = vsel %vm146_vm0, %v678_v42, 0.0  ;;  %v246_v27 = vsel %vm146_vm0, %v680_v44, 0.0 }
  0xc1   :  { %vm402_vm8 = vcmp.eq.s32.totalorder %v953_v4, %v382_v2  ;;  %v465_v43 = vsel %vm146_vm0, %v441_v34, 0.0  ;;  %693 = vpow2.f32 %v229_v46  ;;  %v233_v2 = vmul.f32 1.442695, %v206_v47 }
  0xc2   :  { %v1027_v35 = vsel %vm402_vm8, 1.0, %v742_v8  ;;  %463 = vadd.xlane.f32.xlu0 %v462_v32  ;;  %530 = vadd.xlane.f32.xlu1 %v529_v6  ;;  %695 = vpow2.f32 %v227_v11  ;;  %v231_v6 = vmul.f32 1.442695, %v205_v12  ;;  %v207_v32 = vsub.f32 %v855_v26, %v949_v63  ;;  %v686_v34 = vpop.eup %685 }
  0xc3   :  { %v1033_v38 = vmul.f32 %v970_v24, %v1027_v35  ;;  %v252_v36 = vsel %vm146_vm0, %v684_v20, 0.0  ;;  %v249_v37 = vsel %vm146_vm0, %v682_v62, 0.0  ;;  %697 = vpow2.f32 %v233_v2 }
  0xc4   :  { %v1037_v10 = vpop.permute.xlu1 %360  ;;  %v388_v41 = vpop.permute.xlu0 %387  ;;  %699 = vpow2.f32 %v231_v6  ;;  %v208_v40 = vsub.f32 %v850_v25, %v947_v61  ;;  %v258_v44 = vsel %vm146_vm0, %v686_v34, 0.0  ;;  %vm394_vm12 = vcmp.eq.s32.totalorder %v953_v4, %v1014_v28 }
  0xc5   :  { %vm404_vm9 = vcmp.eq.s32.totalorder %v953_v4, %v388_v41  ;;  %v235_v41 = vmul.f32 1.442695, %v207_v32  ;;  %v209_v34 = vsub.f32 %v869_v30, %v955_v5  ;;  %vm395_vm14 = vcmp.eq.s32.totalorder %v953_v4, %v1037_v10 }
  0xc6   :  { %v1043_v45 = vsel %vm404_vm9, 1.0, %v742_v8  ;;  %533 = vadd.xlane.f32.xlu0 %v532_v0  ;;  %466 = vadd.xlane.f32.xlu1 %v465_v43  ;;  %v688_v39 = vpop.eup %687  ;;  %v237_v11 = vmul.f32 1.442695, %v208_v40 }
  0xc7   :  { %v1049_v48 = vmul.f32 %v970_v24, %v1043_v45  ;;  %v255_v43 = vsel %vm146_vm0, %v688_v39, 0.0  ;;  %701 = vpow2.f32 %v235_v41 }
  0xc8   :  { %v1053_v19 = vpop.permute.xlu1 %363  ;;  %v690_v0 = vpop.eup %689  ;;  %703 = vpow2.f32 %v237_v11 }
  0xc9   :  { %v692_v46 = vpop.eup %691  ;;  %vm396_vm15 = vcmp.eq.s32.totalorder %v953_v4, %v1053_v19 }
  0xca   :  { %244 = vadd.xlane.f32.xlu0 %v243_v23  ;;  %247 = vadd.xlane.f32.xlu1 %v246_v27  ;;  %v261_v23 = vsel %vm146_vm0, %v692_v46, 0.0  ;;  %v264_v27 = vsel %vm146_vm0, %v690_v0, 0.0 }
  0xcb   :  { %v694_v20 = vpop.eup %693 }
  0xcc   :  { %v1059_v33 = vpop.permute.xlu1 %366  ;;  %v696_v2 = vpop.eup %695  ;;  %v270_v40 = vsel %vm146_vm0, %v694_v20, 0.0 }
  0xcd   :  { %v267_v39 = vsel %vm146_vm0, %v696_v2, 0.0  ;;  %vm397_vm1 = vcmp.eq.s32.totalorder %v953_v4, %v1059_v33 }
  0xce   :  { %253 = vadd.xlane.f32.xlu0 %v252_v36  ;;  %250 = vadd.xlane.f32.xlu1 %v249_v37  ;;  %v698_v37 = vpop.eup %697 }
  0xcf   :  { %v700_v41 = vpop.eup %699  ;;  %v276_v46 = vsel %vm146_vm0, %v698_v37, 0.0  ;;  %v427_v37 = vsel %vm395_vm14, 1.0, %v742_v8 }
  0xd0   :  { %v373_v42 = vpop.permute.xlu1 %372  ;;  %v273_v11 = vsel %vm146_vm0, %v700_v41, 0.0  ;;  %v428_v41 = vsel %vm396_vm15, 1.0, %v742_v8 }
  0xd1   :  { %vm399_vm10 = vcmp.eq.s32.totalorder %v953_v4, %v373_v42  ;;  %v426_v42 = vsel %vm394_vm12, 1.0, %v742_v8  ;;  %v702_v20 = vpop.eup %701 }
  0xd2   :  { %v1069_v47 = vsel %vm399_vm10, 1.0, %v742_v8  ;;  %256 = vadd.xlane.f32.xlu0 %v255_v43  ;;  %259 = vadd.xlane.f32.xlu1 %v258_v44  ;;  %v210_v43 = vsub.f32 %v864_v29, %v951_v3  ;;  %v239_v44 = vmul.f32 1.442695, %v209_v34  ;;  %v279_v2 = vsel %vm146_vm0, %v702_v20, 0.0 }
  0xd3   :  { %v1073_v62 = vmul.f32 %v970_v24, %v1069_v47  ;;  %v511_v34 = vmul.f32 %v970_v24, %v1005_v15 }
  0xd4   :  { %v379_v12 = vpop.permute.xlu1 %378  ;;  %705 = vpow2.f32 %v239_v44  ;;  %v444_v44 = vmul.f32 %v428_v41, %v808_v13 }
  0xd5   :  { %vm401_vm11 = vcmp.eq.s32.totalorder %v953_v4, %v379_v12  ;;  %v442_v12 = vmul.f32 %v426_v42, %v794_v9  ;;  %v535_v10 = vsel %vm146_vm0, %v511_v34, 0.0 }
  0xd6   :  { %v1079_v6 = vsel %vm401_vm11, 1.0, %v742_v8  ;;  %262 = vadd.xlane.f32.xlu0 %v261_v23  ;;  %265 = vadd.xlane.f32.xlu1 %v264_v27  ;;  %v241_v23 = vmul.f32 1.442695, %v210_v43 }
  0xd7   :  { %v1085_v32 = vmul.f32 %v970_v24, %v1079_v6  ;;  %v468_v27 = vsel %vm146_vm0, %v442_v12, 0.0  ;;  %v429_v12 = vsel %vm397_vm1, 1.0, %v742_v8 }
  0xd8   :  { %v385_v36 = vpop.permute.xlu1 %384  ;;  %707 = vpow2.f32 %v241_v23  ;;  %v514_v23 = vmul.f32 %v970_v24, %v428_v41  ;;  %v515_v34 = vmul.f32 %v970_v24, %v429_v12 }
  0xd9   :  { %vm403_vm13 = vcmp.eq.s32.totalorder %v953_v4, %v385_v36  ;;  %v704_v36 = vpop.eup %703 }
  0xda   :  { %v1094_v28 = vsel %vm403_vm13, 1.0, %v742_v8  ;;  %268 = vadd.xlane.f32.xlu0 %v267_v39  ;;  %271 = vadd.xlane.f32.xlu1 %v270_v40  ;;  %v282_v9 = vsel %vm146_vm0, %v704_v36, 0.0  ;;  %v512_v39 = vmul.f32 %v970_v24, %v426_v42  ;;  %v443_v40 = vmul.f32 %v427_v37, %v813_v14 }
  0xdb   :  { %v1098_v0 = vmul.f32 %v970_v24, %v1094_v28  ;;  %v474_v42 = vsel %vm146_vm0, %v444_v44, 0.0  ;;  %v544_v33 = vsel %vm146_vm0, %v514_v23, 0.0  ;;  %v446_v8 = vmul.f32 %v988_v1, %v822_v17 }
  0xdc   :  { %v538_v15 = vsel %vm146_vm0, %v512_v39, 0.0  ;;  %v471_v43 = vsel %vm146_vm0, %v443_v40, 0.0  ;;  %v547_v36 = vsel %vm146_vm0, %v515_v34, 0.0  ;;  %v553_v17 = vsel %vm146_vm0, %v1073_v62, 0.0 }
  0xde   :  { %277 = vadd.xlane.f32.xlu0 %v276_v46  ;;  %274 = vadd.xlane.f32.xlu1 %v273_v11  ;;  %v706_v19 = vpop.eup %705  ;;  %v513_v46 = vmul.f32 %v970_v24, %v427_v37  ;;  %v480_v37 = vsel %vm146_vm0, %v446_v8, 0.0  ;;  %v448_v24 = vmul.f32 %v1008_v16, %v836_v21  ;;  %v450_v21 = vmul.f32 %v1027_v35, %v850_v25 }
  0xdf   :  { %v285_v14 = vsel %vm146_vm0, %v706_v19, 0.0  ;;  %v559_v16 = vsel %vm146_vm0, %v1085_v32, 0.0  ;;  %v452_v25 = vmul.f32 %v1043_v45, %v864_v29  ;;  %v565_v35 = vsel %vm146_vm0, %v1098_v0, 0.0 }
  0xe0   :  { %v541_v13 = vsel %vm146_vm0, %v513_v46, 0.0  ;;  %v486_v1 = vsel %vm146_vm0, %v448_v24, 0.0  ;;  %v492_v62 = vsel %vm146_vm0, %v450_v21, 0.0 }
  0xe1   :  { %v498_v32 = vsel %vm146_vm0, %v452_v25, 0.0 }
  0xe2   :  { %469 = vadd.xlane.f32.xlu0 %v468_v27  ;;  %280 = vadd.xlane.f32.xlu1 %v279_v2  ;;  %v708_v11 = vpop.eup %707  ;;  %v445_v27 = vmul.f32 %v429_v12, %v827_v18  ;;  %v447_v18 = vmul.f32 %v1069_v47, %v841_v22  ;;  %v449_v22 = vmul.f32 %v1079_v6, %v855_v26 }
  0xe3   :  { %v288_v20 = vsel %vm146_vm0, %v708_v11, 0.0  ;;  %v451_v26 = vmul.f32 %v1094_v28, %v869_v30  ;;  %v568_v30 = vsel %vm146_vm0, %v1049_v48, 0.0 }
  0xe4   :  { %v477_v2 = vsel %vm146_vm0, %v445_v27, 0.0  ;;  %v489_v47 = vsel %vm146_vm0, %v449_v22, 0.0 }
  0xe5   :  { %v495_v6 = vsel %vm146_vm0, %v451_v26, 0.0 }
  0xe6   :  { %283 = vadd.xlane.f32.xlu0 %v282_v9  ;;  %536 = vadd.xlane.f32.xlu1 %v535_v10  ;;  %v550_v9 = vsel %vm146_vm0, %v998_v7, 0.0  ;;  %v483_v10 = vsel %vm146_vm0, %v447_v18, 0.0  ;;  %v556_v7 = vsel %vm146_vm0, %v1019_v31, 0.0  ;;  %v562_v31 = vsel %vm146_vm0, %v1033_v38, 0.0 }
  0xe7   :  { %vm664_vm0 = vcmp.eq.s32.totalorder %v953_v4, 1 }
  0xea   :  { %539 = vadd.xlane.f32.xlu0 %v538_v15  ;;  %472 = vadd.xlane.f32.xlu1 %v471_v43 }
  0xee   :  { %475 = vadd.xlane.f32.xlu0 %v474_v42  ;;  %286 = vadd.xlane.f32.xlu1 %v285_v14 }
  0xf2   :  { %289 = vadd.xlane.f32.xlu0 %v288_v20  ;;  %542 = vadd.xlane.f32.xlu1 %v541_v13 }
  0xf6   :  { %545 = vadd.xlane.f32.xlu0 %v544_v33  ;;  %478 = vadd.xlane.f32.xlu1 %v477_v2 }
  0xfa   :  { %548 = vadd.xlane.f32.xlu0 %v547_v36  ;;  %481 = vadd.xlane.f32.xlu1 %v480_v37 }
  0xfe   :  { %551 = vadd.xlane.f32.xlu0 %v550_v9  ;;  %484 = vadd.xlane.f32.xlu1 %v483_v10 }
 0x102   :  { %554 = vadd.xlane.f32.xlu0 %v553_v17  ;;  %487 = vadd.xlane.f32.xlu1 %v486_v1 }
 0x106   :  { %557 = vadd.xlane.f32.xlu0 %v556_v7  ;;  %490 = vadd.xlane.f32.xlu1 %v489_v47 }
 0x10a   :  { %560 = vadd.xlane.f32.xlu0 %v559_v16  ;;  %493 = vadd.xlane.f32.xlu1 %v492_v62 }
 0x10e   :  { %563 = vadd.xlane.f32.xlu0 %v562_v31  ;;  %496 = vadd.xlane.f32.xlu1 %v495_v6 }
 0x112   :  { %566 = vadd.xlane.f32.xlu0 %v565_v35  ;;  %499 = vadd.xlane.f32.xlu1 %v498_v32 }
 0x116   :  { %569 = vadd.xlane.f32.xlu1 %v568_v30 }
 0x143   :  { %v458_v28 = vpop.xlane.xlu0 %457 }
 0x147   :  { %v455_v38 = vpop.xlane.xlu1 %454  ;;  %v1171_v39 = vpop.xlane.xlu0 %460 }
 0x14b   :  { %v1173_v40 = vpop.xlane.xlu1 %524  ;;  %v1175_v29 = vpop.xlane.xlu0 %527 }
 0x14f   :  { %v1177_v45 = vpop.xlane.xlu1 %530  ;;  %v1179_v41 = vpop.xlane.xlu0 %463 }
 0x153   :  { %v1181_v0 = vpop.xlane.xlu1 %466  ;;  %v1183_v15 = vpop.xlane.xlu0 %533 }
 0x157   :  { %v248_v43 = vpop.xlane.xlu1 %247  ;;  %v245_v44 = vpop.xlane.xlu0 %244 }
 0x158   :  { %709 = vlog2.f32 %v248_v43 }
 0x159   :  { %711 = vlog2.f32 %v245_v44 }
 0x15b   :  { %v251_v48 = vpop.xlane.xlu1 %250  ;;  %v254_v19 = vpop.xlane.xlu0 %253 }
 0x15c   :  { %713 = vlog2.f32 %v251_v48 }
 0x15d   :  { %715 = vlog2.f32 %v254_v19 }
 0x15f   :  { %v260_v42 = vpop.xlane.xlu1 %259  ;;  %v257_v14 = vpop.xlane.xlu0 %256 }
 0x160   :  { %717 = vlog2.f32 %v257_v14 }
 0x161   :  { %719 = vlog2.f32 %v260_v42 }
 0x162   :  { %v710_v2 = vpop.eup %709 }
 0x163   :  { %v266_v46 = vpop.xlane.xlu1 %265  ;;  %v263_v11 = vpop.xlane.xlu0 %262  ;;  %v294_v18 = vmul.f32 0.6931472, %v710_v2 }
 0x164   :  { %v712_v36 = vpop.eup %711  ;;  %721 = vlog2.f32 %v263_v11 }
 0x165   :  { %v292_v9 = vmul.f32 0.6931472, %v712_v36  ;;  %v324_v1 = vadd.f32 %v294_v18, %v929_v52  ;;  %723 = vlog2.f32 %v266_v46 }
 0x166   :  { %v714_v37 = vpop.eup %713 }
 0x167   :  { %v272_v12 = vpop.xlane.xlu1 %271  ;;  %v269_v20 = vpop.xlane.xlu0 %268  ;;  %v296_v17 = vmul.f32 0.6931472, %v714_v37  ;;  %v323_v22 = vadd.f32 %v292_v9, %v925_v50  ;;  %v572_v26 = vsub.f32 %v324_v1, %v458_v28 }
 0x168   :  { %v716_v21 = vpop.eup %715  ;;  %725 = vlog2.f32 %v269_v20 }
 0x169   :  { %v325_v16 = vadd.f32 %v296_v17, %v923_v49  ;;  %v571_v31 = vsub.f32 %v323_v22, %v455_v38  ;;  %v298_v6 = vmul.f32 0.6931472, %v716_v21  ;;  %727 = vlog2.f32 %v272_v12 }
 0x16a   :  { %v718_v62 = vpop.eup %717  ;;  %v604_v30 = vmul.f32 %v572_v26, %v1175_v29 }
 0x16b   :  { %v275_v13 = vpop.xlane.xlu1 %274  ;;  %v278_v23 = vpop.xlane.xlu0 %277  ;;  %v573_v50 = vsub.f32 %v325_v16, %v1171_v39  ;;  %v300_v32 = vmul.f32 0.6931472, %v718_v62  ;;  %v603_v43 = vmul.f32 %v571_v31, %v1173_v40  ;;  %v326_v49 = vadd.f32 %v298_v6, %v927_v51 }
 0x16c   :  { %v720_v52 = vpop.eup %719  ;;  %729 = vlog2.f32 %v275_v13  ;;  %v641_v51 = vadd.f32 %v1175_v29, %v1173_v40 }
 0x16d   :  { %v302_v38 = vmul.f32 0.6931472, %v720_v52  ;;  %731 = vlog2.f32 %v278_v23  ;;  %v605_v19 = vmul.f32 %v573_v50, %v1177_v45  ;;  %v327_v42 = vadd.f32 %v300_v32, %v933_v54 }
 0x16e   :  { %v722_v48 = vpop.eup %721  ;;  %v574_v39 = vsub.f32 %v326_v49, %v1179_v41  ;;  %v619_v46 = vadd.f32 %v604_v30, %v603_v43 }
 0x16f   :  { %v281_v27 = vpop.xlane.xlu1 %280  ;;  %v1185_v33 = vpop.xlane.xlu0 %469  ;;  %v304_v20 = vmul.f32 0.6931472, %v722_v48  ;;  %v328_v13 = vadd.f32 %v302_v38, %v931_v53  ;;  %v575_v36 = vsub.f32 %v327_v42, %v1181_v0 }
 0x170   :  { %v724_v14 = vpop.eup %723  ;;  %733 = vlog2.f32 %v281_v27  ;;  %v620_v37 = vadd.f32 %v619_v46, %v605_v19  ;;  %v642_v27 = vadd.f32 %v641_v51, %v1177_v45  ;;  %v606_v41 = vmul.f32 %v574_v39, %v1183_v15 }
 0x171   :  { %v306_v2 = vmul.f32 0.6931472, %v724_v14  ;;  %v329_v1 = vadd.f32 %v304_v20, %v937_v56 }
 0x172   :  { %v726_v23 = vpop.eup %725  ;;  %v643_v29 = vadd.f32 %v642_v27, %v1183_v15  ;;  %v621_v22 = vadd.f32 %v620_v37, %v606_v41 }
 0x173   :  { %v1187_v34 = vpop.xlane.xlu1 %536  ;;  %v284_v8 = vpop.xlane.xlu0 %283  ;;  %v308_v53 = vmul.f32 0.6931472, %v726_v23  ;;  %v330_v21 = vadd.f32 %v306_v2, %v935_v55 }
 0x174   :  { %735 = vlog2.f32 %v284_v8  ;;  %v728_v54 = vpop.eup %727  ;;  %v607_v18 = vmul.f32 %v575_v36, %v1187_v34  ;;  %v576_v8 = vsub.f32 %v328_v13, %v1185_v33 }
 0x175   :  { %v310_v0 = vmul.f32 0.6931472, %v728_v54  ;;  %v331_v55 = vadd.f32 %v308_v53, %v941_v58 }
 0x176   :  { %v730_v40 = vpop.eup %729  ;;  %v622_v31 = vadd.f32 %v621_v22, %v607_v18 }
 0x177   :  { %v1189_v10 = vpop.xlane.xlu1 %472  ;;  %v1191_v24 = vpop.xlane.xlu0 %539  ;;  %v312_v26 = vmul.f32 0.6931472, %v730_v40 }
 0x178   :  { %v732_v45 = vpop.eup %731  ;;  %v577_v16 = vsub.f32 %v329_v1, %v1189_v10  ;;  %v608_v62 = vmul.f32 %v576_v8, %v1191_v24 }
 0x179   :  { %v314_v32 = vmul.f32 0.6931472, %v732_v45  ;;  %v333_v48 = vadd.f32 %v312_v26, %v945_v60 }
 0x17a   :  { %v734_v52 = vpop.eup %733  ;;  %v623_v30 = vadd.f32 %v622_v31, %v608_v62 }
 0x17b   :  { %v287_v7 = vpop.xlane.xlu1 %286  ;;  %v1195_v47 = vpop.xlane.xlu0 %475  ;;  %v316_v38 = vmul.f32 0.6931472, %v734_v52 }
 0x17c   :  { %737 = vlog2.f32 %v287_v7  ;;  %v644_v7 = vadd.f32 %v643_v29, %v1187_v34  ;;  %v578_v56 = vsub.f32 %v330_v21, %v1195_v47  ;;  %v332_v34 = vadd.f32 %v310_v0, %v939_v57 }
 0x17d   :  { %v334_v57 = vadd.f32 %v314_v32, %v943_v59 }
 0x17e   :  { %v645_v33 = vadd.f32 %v644_v7, %v1191_v24  ;;  %v736_v10 = vpop.eup %735 }
 0x17f   :  { %v1198_v25 = vpop.xlane.xlu1 %542  ;;  %v290_v35 = vpop.xlane.xlu0 %289  ;;  %v318_v46 = vmul.f32 0.6931472, %v736_v10 }
 0x180   :  { %739 = vlog2.f32 %v290_v35  ;;  %v609_v50 = vmul.f32 %v577_v16, %v1198_v25  ;;  %v646_v35 = vadd.f32 %v645_v33, %v1198_v25 }
 0x182   :  { %v624_v42 = vadd.f32 %v623_v30, %v609_v50 }
 0x183   :  { %v1204_v44 = vpop.xlane.xlu1 %478  ;;  %v546_v28 = vpop.xlane.xlu0 %545 }
 0x184   :  { %v579_v43 = vsub.f32 %v331_v55, %v1204_v44  ;;  %v610_v49 = vmul.f32 %v578_v56, %v546_v28  ;;  %v647_v14 = vadd.f32 %v646_v35, %v546_v28  ;;  %v335_v44 = vadd.f32 %v316_v38, %v949_v63 }
 0x185   :  { %v336_v28 = vadd.f32 %v318_v46, %v947_v61 }
 0x186   :  { %v738_v47 = vpop.eup %737  ;;  %v625_v51 = vadd.f32 %v624_v42, %v610_v49 }
 0x187   :  { %v482_v11 = vpop.xlane.xlu1 %481  ;;  %v549_v12 = vpop.xlane.xlu0 %548  ;;  %v320_v23 = vmul.f32 0.6931472, %v738_v47 }
 0x188   :  { %v580_v39 = vsub.f32 %v332_v34, %v482_v11  ;;  %v611_v58 = vmul.f32 %v579_v43, %v549_v12  ;;  %v648_v20 = vadd.f32 %v647_v14, %v549_v12 }
 0x189   :  { %v337_v12 = vadd.f32 %v320_v23, %v955_v5 }
 0x18a   :  { %v740_v60 = vpop.eup %739  ;;  %v626_v37 = vadd.f32 %v625_v51, %v611_v58 }
 0x18b   :  { %v485_v9 = vpop.xlane.xlu1 %484  ;;  %v552_v17 = vpop.xlane.xlu0 %551  ;;  %v322_v29 = vmul.f32 0.6931472, %v740_v60 }
 0x18c   :  { %v581_v13 = vsub.f32 %v333_v48, %v485_v9  ;;  %v612_v25 = vmul.f32 %v580_v39, %v552_v17  ;;  %v649_v54 = vadd.f32 %v648_v20, %v552_v17 }
 0x18d   :  { %v338_v26 = vadd.f32 %v322_v29, %v951_v3 }
 0x18e   :  { %v627_v11 = vadd.f32 %v626_v37, %v612_v25 }
 0x18f   :  { %v488_v15 = vpop.xlane.xlu1 %487  ;;  %v555_v6 = vpop.xlane.xlu0 %554 }
 0x190   :  { %v582_v27 = vsub.f32 %v334_v57, %v488_v15  ;;  %v613_v41 = vmul.f32 %v581_v13, %v555_v6  ;;  %v650_v18 = vadd.f32 %v649_v54, %v555_v6 }
 0x192   :  { %v628_v8 = vadd.f32 %v627_v11, %v613_v41 }
 0x193   :  { %v491_v24 = vpop.xlane.xlu1 %490  ;;  %v558_v19 = vpop.xlane.xlu0 %557 }
 0x194   :  { %v583_v40 = vsub.f32 %v335_v44, %v491_v24  ;;  %v614_v59 = vmul.f32 %v582_v27, %v558_v19  ;;  %v651_v63 = vadd.f32 %v650_v18, %v558_v19 }
 0x196   :  { %v629_v22 = vadd.f32 %v628_v8, %v614_v59 }
 0x197   :  { %v494_v2 = vpop.xlane.xlu1 %493  ;;  %v561_v36 = vpop.xlane.xlu0 %560 }
 0x198   :  { %v584_v1 = vsub.f32 %v336_v28, %v494_v2  ;;  %v615_v0 = vmul.f32 %v583_v40, %v561_v36  ;;  %v652_v21 = vadd.f32 %v651_v63, %v561_v36 }
 0x19a   :  { %v630_v61 = vadd.f32 %v629_v22, %v615_v0 }
 0x19b   :  { %v497_v9 = vpop.xlane.xlu1 %496  ;;  %v564_v53 = vpop.xlane.xlu0 %563 }
 0x19c   :  { %v585_v17 = vsub.f32 %v337_v12, %v497_v9  ;;  %v616_v45 = vmul.f32 %v584_v1, %v564_v53  ;;  %v653_v62 = vadd.f32 %v652_v21, %v564_v53 }
 0x19e   :  { %v631_v15 = vadd.f32 %v630_v61, %v616_v45 }
 0x19f   :  { %v500_v7 = vpop.xlane.xlu1 %499  ;;  %v567_v16 = vpop.xlane.xlu0 %566 }
 0x1a0   :  { %v617_v31 = vmul.f32 %v585_v17, %v567_v16  ;;  %v586_v6 = vsub.f32 %v338_v26, %v500_v7  ;;  %v654_v5 = vadd.f32 %v653_v62, %v567_v16 }
 0x1a2   :  { %v632_v33 = vadd.f32 %v631_v15, %v617_v31 }
 0x1a3   :  { %v570_v52 = vpop.xlane.xlu1 %569 }
 0x1a4   :  { %v618_v56 = vmul.f32 %v586_v6, %v570_v52  ;;  %v655_v50 = vadd.f32 %v654_v5, %v570_v52 }
 0x1a6   :  { %v633_v55 = vadd.f32 %v632_v33, %v618_v56  ;;  %v656_v32 = vrot.slane %v655_v50, 4 }
 0x1a8   :  { %v634_v34 = vrot.slane %v633_v55, 4  ;;  %v657_v10 = vadd.f32 %v656_v32, %v655_v50 }
 0x1aa   :  { %v635_v30 = vadd.f32 %v634_v34, %v633_v55  ;;  %v658_v35 = vrot.slane %v657_v10, 2 }
 0x1ac   :  { %v636_v43 = vrot.slane %v635_v30, 2  ;;  %v659_v49 = vadd.f32 %v658_v35, %v657_v10 }
 0x1ae   :  { %v637_v38 = vadd.f32 %v636_v43, %v635_v30  ;;  %v660_v48 = vrot.slane %v659_v49, 1 }
 0x1b0   :  { %v638_v3 = vrot.slane %v637_v38, 1  ;;  %v661_v24 = vadd.f32 %v660_v48, %v659_v49 }
 0x1b2   :  { %v639_v19 = vadd.f32 %v638_v3, %v637_v38  ;;  %v665_v47 = vsel %vm664_vm0, %v661_v24, 0.0 }
 0x1b4   :  { %v666_v42 = vsel %vm663_vm2, %v639_v19, %v665_v47 }
 0x1b5   :  { %667 = vst [vmem:[%s1244_s3] sm:$0x1] %v666_v42 }

</bundles_post_ra>
